<compile_context>
chip_gen: v5e
topology: v5e:2x2
jax: 0.10.0
libtpu: 0.0.40
codegen_flags: <defaults>
</compile_context>

<pallas_src>
import functools

import jax
import jax.numpy as jnp
from jax.experimental import pallas as pl
from jax.experimental.pallas import tpu as pltpu

_LANE = 128                     # output lane dim (batch) tiles in multiples of this
_SUBLANE = 8                    # prediction rows padded to a sublane multiple
_MAX_TILE_B = 8192              # upper bound on rows per grid step
_VMEM_BUDGET_BYTES = 12 * 1024 * 1024   # double-buffer budget; under v5e's 16 MiB default


def _round_up(x, m):
    return (x + m - 1) // m * m


def _fused_embed_kernel(bat_ref, bowl_ref, wb_ref, ww_ref, b_ref, o_ref):
    # o[p, n] = sigmoid( sum_f Wb[p,f]*bat[n,f] + sum_f Ww[p,f]*bowl[n,f] + b[p] )
    dims = (((1,), (1,)), ((), ()))
    z = jax.lax.dot_general(wb_ref[...], bat_ref[...], dims,
                            preferred_element_type=jnp.float32)
    z = z + jax.lax.dot_general(ww_ref[...], bowl_ref[...], dims,
                                preferred_element_type=jnp.float32)
    o_ref[...] = jax.nn.sigmoid(z + b_ref[...])


def prepare_params(params):
    """One-time preprocessing: collapse the three Linears into two small transposed affines."""
    hi = jax.lax.Precision.HIGHEST
    w1, b1 = params["batsman_embed.weight"], params["batsman_embed.bias"]
    w2, b2 = params["bowler_embed.weight"], params["bowler_embed.bias"]
    w3, b3 = params["embed_to_res.weight"], params["embed_to_res.bias"]

    bat_dim = w1.shape[0]
    pred_size = w3.shape[0]
    pred_pad = _round_up(pred_size, _SUBLANE)

    w3a = w3[:, :bat_dim]                   # [pred, bat_dim]
    w3b = w3[:, bat_dim:]                   # [pred, bowl_dim]

    wb_eff = jnp.dot(w3a, w1, precision=hi).astype(jnp.float32)   # [pred, num_batsman]
    ww_eff = jnp.dot(w3b, w2, precision=hi).astype(jnp.float32)   # [pred, num_bowlers]
    b_eff = (jnp.dot(w3a, b1, precision=hi)
             + jnp.dot(w3b, b2, precision=hi) + b3).astype(jnp.float32)   # [pred]

    # Zero-pad prediction rows to a sublane multiple; padded rows are sliced off later.
    rp = pred_pad - pred_size
    wb_eff = jnp.pad(wb_eff, ((0, rp), (0, 0)))
    ww_eff = jnp.pad(ww_eff, ((0, rp), (0, 0)))
    b_eff = jnp.pad(b_eff, (0, rp)).reshape(pred_pad, 1)

    return {"wb_eff": wb_eff, "ww_eff": ww_eff, "b_eff": b_eff,
            "pred_size": pred_size}


@functools.partial(jax.jit, static_argnames=("pred_size",))
def _forward_impl(batters, bowlers, wb_eff, ww_eff, b_eff, pred_size):
    B, fb = batters.shape
    fw = bowlers.shape[1]
    pred_pad = wb_eff.shape[0]

    batters = batters.astype(jnp.float32)
    bowlers = bowlers.astype(jnp.float32)

    if B <= _LANE:
        # Single full-extent block: no padding, no ragged blocks.
        tile_b = B
    else:
        # VMEM cap: double-buffered input + output bytes per batch row.
        row_bytes = 4 * (fb + fw + pred_pad)
        vmem_cap = max(_LANE,
                       (_VMEM_BUDGET_BYTES // (2 * row_bytes)) // _LANE * _LANE)
        # v7x: ensure at least 2 grid steps so both TensorCores get work.
        half = _round_up(pl.cdiv(B, 2), _LANE)
        tile_b = max(_LANE, min(_MAX_TILE_B, vmem_cap, half))

    grid = (pl.cdiv(B, tile_b),)

    out = pl.pallas_call(
        _fused_embed_kernel,
        out_shape=jax.ShapeDtypeStruct((pred_pad, B), jnp.float32),
        grid=grid,
        in_specs=[
            pl.BlockSpec((tile_b, fb), lambda i: (i, 0)),       # batters, batch-tiled
            pl.BlockSpec((tile_b, fw), lambda i: (i, 0)),       # bowlers, batch-tiled
            pl.BlockSpec((pred_pad, fb), lambda i: (0, 0)),     # Wb, resident
            pl.BlockSpec((pred_pad, fw), lambda i: (0, 0)),     # Ww, resident
            pl.BlockSpec((pred_pad, 1), lambda i: (0, 0)),      # bias, resident
        ],
        out_specs=pl.BlockSpec((pred_pad, tile_b), lambda i: (0, i)),   # lane-dense [pred, B]
        compiler_params=pltpu.CompilerParams(
            dimension_semantics=("parallel",)),
    )(batters, bowlers, wb_eff, ww_eff, b_eff)

    # [pred_pad, B] -> [B, pred_size] to match the PyTorch module's output layout.
    # TODO(synk): hand out[:pred_size] (shape [pred, B]) to the consumer directly if it
    # accepts the transposed layout, saving this final tiny transpose pass.
    return out[:pred_size].T


def embed_model_forward(batters, bowlers, prepared):
    """Fused forward pass of Embed_Model using pre-prepared parameters."""
    return _forward_impl(batters, bowlers, prepared["wb_eff"], prepared["ww_eff"],
                         prepared["b_eff"], prepared["pred_size"])


def init_params(key, num_batsman, batsman_embed_dim, num_bowlers,
                bowler_embed_dim, pred_size=11):
    """Deterministic parameter init matching the PyTorch module's shapes."""
    ks = jax.random.split(key, 6)

    def linear_init(kw, kb, fan_in, fan_out):
        bound = 1.0 / jnp.sqrt(fan_in)
        w = jax.random.uniform(kw, (fan_out, fan_in), jnp.float32, -bound, bound)
        b = jax.random.uniform(kb, (fan_out,), jnp.float32, -bound, bound)
        return w, b

    w1, b1 = linear_init(ks[0], ks[1], num_batsman, batsman_embed_dim)
    w2, b2 = linear_init(ks[2], ks[3], num_bowlers, bowler_embed_dim)
    w3, b3 = linear_init(ks[4], ks[5],
                         batsman_embed_dim + bowler_embed_dim, pred_size)
    return {
        "batsman_embed.weight": w1, "batsman_embed.bias": b1,
        "bowler_embed.weight": w2, "bowler_embed.bias": b2,
        "embed_to_res.weight": w3, "embed_to_res.bias": b3,
    }


def _reference_forward(batters, bowlers, params):
    # Pure-JAX reference mirroring the PyTorch forward exactly.
    bat_e = batters @ params["batsman_embed.weight"].T + params["batsman_embed.bias"]
    bowl_e = bowlers @ params["bowler_embed.weight"].T + params["bowler_embed.bias"]
    emb = jnp.concatenate([bat_e, bowl_e], axis=1)
    return jax.nn.sigmoid(emb @ params["embed_to_res.weight"].T
                          + params["embed_to_res.bias"])


if __name__ == "__main__":
    # Small synthetic shapes consistent with the module.
    B = 8
    num_batsman, batsman_embed_dim = 32, 16
    num_bowlers, bowler_embed_dim = 24, 16
    pred_size = 11

    key = jax.random.PRNGKey(0)
    k_bat, k_bowl, k_params = jax.random.split(key, 3)

    batters = jax.random.normal(k_bat, (B, num_batsman), jnp.float32)
    bowlers = jax.random.normal(k_bowl, (B, num_bowlers), jnp.float32)
    params = init_params(k_params, num_batsman, batsman_embed_dim,
                         num_bowlers, bowler_embed_dim, pred_size)

    prepared = prepare_params(params)          # one-time, outside the forward path
    out = embed_model_forward(batters, bowlers, prepared)
    out = jax.block_until_ready(out)

    ref = _reference_forward(batters, bowlers, params)
    assert out.shape == (B, pred_size)
    assert jnp.allclose(out, ref, atol=1e-5, rtol=1e-5)

    print("KERNEL_OK")
</pallas_src>

<mosaic_0001>
module attributes {stable_mosaic.version = 11 : i64} {
  func.func @_fused_embed_kernel(%arg0: i32, %arg1: memref<8x32xf32, #tpu.memory_space<vmem>>, %arg2: memref<8x24xf32, #tpu.memory_space<vmem>>, %arg3: memref<16x32xf32, #tpu.memory_space<vmem>>, %arg4: memref<16x24xf32, #tpu.memory_space<vmem>>, %arg5: memref<16x1xf32, #tpu.memory_space<vmem>>, %arg6: memref<16x8xf32, #tpu.memory_space<vmem>>) attributes {dimension_semantics = [#tpu.dimension_semantics<parallel>], iteration_bounds = array<i64: 1>, scalar_prefetch = 0 : i64, scratch_operands = 0 : i64, tpu.core_type = #tpu.core_type<tc>, window_params = [{transform_indices = @transform_0, window_bounds = array<i64: 8, 32>}, {transform_indices = @transform_1, window_bounds = array<i64: 8, 24>}, {pipeline_mode = #tpu.pipeline_mode<synchronous>, transform_indices = @transform_2, window_bounds = array<i64: 16, 32>}, {pipeline_mode = #tpu.pipeline_mode<synchronous>, transform_indices = @transform_3, window_bounds = array<i64: 16, 24>}, {pipeline_mode = #tpu.pipeline_mode<synchronous>, transform_indices = @transform_4, window_bounds = array<i64: 16, 1>}, {transform_indices = @transform_5, window_bounds = array<i64: 16, 8>}]} {
    %c0 = arith.constant 0 : index
    %c0_0 = arith.constant 0 : index
    %0 = vector.load %arg3[%c0, %c0_0] : memref<16x32xf32, #tpu.memory_space<vmem>>, vector<16x32xf32>
    %c0_1 = arith.constant 0 : index
    %c0_2 = arith.constant 0 : index
    %1 = vector.load %arg1[%c0_1, %c0_2] : memref<8x32xf32, #tpu.memory_space<vmem>>, vector<8x32xf32>
    %cst = arith.constant dense<0.000000e+00> : vector<16x8xf32>
    %2 = tpu.matmul %0, %1, %cst {dimension_numbers = #tpu.dot_dimension_numbers<[1], [1], [0], [0], [0, 0, 1, 0], [], []>} : vector<16x32xf32>, vector<8x32xf32>, vector<16x8xf32> -> vector<16x8xf32>
    %c0_3 = arith.constant 0 : index
    %c0_4 = arith.constant 0 : index
    %3 = vector.load %arg4[%c0_3, %c0_4] : memref<16x24xf32, #tpu.memory_space<vmem>>, vector<16x24xf32>
    %c0_5 = arith.constant 0 : index
    %c0_6 = arith.constant 0 : index
    %4 = vector.load %arg2[%c0_5, %c0_6] : memref<8x24xf32, #tpu.memory_space<vmem>>, vector<8x24xf32>
    %cst_7 = arith.constant dense<0.000000e+00> : vector<16x8xf32>
    %5 = tpu.matmul %3, %4, %cst_7 {dimension_numbers = #tpu.dot_dimension_numbers<[1], [1], [0], [0], [0, 0, 1, 0], [], []>} : vector<16x24xf32>, vector<8x24xf32>, vector<16x8xf32> -> vector<16x8xf32>
    %6 = arith.addf %2, %5 : vector<16x8xf32>
    %c0_8 = arith.constant 0 : index
    %c0_9 = arith.constant 0 : index
    %7 = vector.load %arg5[%c0_8, %c0_9] : memref<16x1xf32, #tpu.memory_space<vmem>>, vector<16x1xf32>
    %8 = vector.broadcast %7 : vector<16x1xf32> to vector<16x8xf32>
    %9 = arith.addf %6, %8 : vector<16x8xf32>
    %10 = arith.negf %9 : vector<16x8xf32>
    %11 = math.exp %10 : vector<16x8xf32>
    %cst_10 = arith.constant 1.000000e+00 : f32
    %12 = vector.broadcast %cst_10 : f32 to vector<16x8xf32>
    %13 = arith.addf %12, %11 : vector<16x8xf32>
    %14 = arith.divf %12, %13 : vector<16x8xf32>
    %c0_11 = arith.constant 0 : index
    %c0_12 = arith.constant 0 : index
    %15 = vector.load %arg6[%c0_11, %c0_12] : memref<16x8xf32, #tpu.memory_space<vmem>>, vector<16x8xf32>
    tpu.vector_store %arg6[%c0_11, %c0_12], %14 {strides = array<i32>} : memref<16x8xf32, #tpu.memory_space<vmem>>, vector<16x8xf32>,
    return
  }
  func.func @transform_0(%arg0: i32) -> (i32, i32) {
    %c0_i32 = arith.constant 0 : i32
    %c0_i32_0 = arith.constant 0 : i32
    return %arg0, %c0_i32 : i32, i32
  }
  func.func @transform_1(%arg0: i32) -> (i32, i32) {
    %c0_i32 = arith.constant 0 : i32
    %c0_i32_0 = arith.constant 0 : i32
    return %arg0, %c0_i32 : i32, i32
  }
  func.func @transform_2(%arg0: i32) -> (i32, i32) {
    %c0_i32 = arith.constant 0 : i32
    %c0_i32_0 = arith.constant 0 : i32
    %c0_i32_1 = arith.constant 0 : i32
    return %c0_i32, %c0_i32_0 : i32, i32
  }
  func.func @transform_3(%arg0: i32) -> (i32, i32) {
    %c0_i32 = arith.constant 0 : i32
    %c0_i32_0 = arith.constant 0 : i32
    %c0_i32_1 = arith.constant 0 : i32
    return %c0_i32, %c0_i32_0 : i32, i32
  }
  func.func @transform_4(%arg0: i32) -> (i32, i32) {
    %c0_i32 = arith.constant 0 : i32
    %c0_i32_0 = arith.constant 0 : i32
    %c0_i32_1 = arith.constant 0 : i32
    return %c0_i32, %c0_i32_0 : i32, i32
  }
  func.func @transform_5(%arg0: i32) -> (i32, i32) {
    %c0_i32 = arith.constant 0 : i32
    %c0_i32_0 = arith.constant 0 : i32
    return %c0_i32, %arg0 : i32, i32
  }
}

</mosaic_0001>

<bundles_post_ra>
// kernel: _forward_impl.1
= control target key start
LH: loop header
LB: loop body
LE: loop exit
PB: predicated region body
PF: predicated region fallthrough
CT: control target
= control target key end

     0   :  { %10 = vsyncpa [#allocation3], 0  ;;  %s366_s0 = inlined_call_operand.hbm [shape: f32[8,32], index: 0, kind: input, shape index: {}]   ;;  %s367_s1 = inlined_call_operand.hbm [shape: f32[8,24], index: 1, kind: input, shape index: {}]   ;;  %s368_s2 = inlined_call_operand.vmem [shape: f32[16,32], index: 2, kind: input, shape index: {}]   ;;  %s369_s3 = inlined_call_operand.hbm [shape: f32[16,24], index: 3, kind: input, shape index: {}]   ;;  %s370_s4 = inlined_call_operand.vmem [shape: f32[16,1], index: 4, kind: input, shape index: {}]   ;;  %s371_s5 = inlined_call_operand.vmem [shape: f32[16,8], index: 5, kind: output, shape index: {}]  }
   0x1   :  { %11 = vsyncpa [#allocation5], 0  ;;  %s28_s20 = sshll.u32 %s367_s1, 4  ;;  %s297_s21 = smov [#allocation4]   ;;  %s29_s20 = int_to_ptr.hbm [resolvable:$true] %s28_s20 }
   0x2   :  { %s30_s22 = sshll.u32 %s297_s21, 4  ;;  %s17_s25 = sshll.u32 %s366_s0, 4  ;;  %s31_s22 = int_to_ptr.vmem [resolvable:$true] %s30_s22  ;;  %s18_s25 = int_to_ptr.hbm [resolvable:$true] %s17_s25 }
   0x3   :  { %33 = dma.hbm_to_vmem [thread:$0]  %s29_s20, 128, %s31_s22, [#allocation5]  }
   0x4   :  { %s298_s26 = smov [#allocation2]   ;;  %s40_s30 = sshll.u32 %s369_s3, 4  ;;  %s41_s30 = int_to_ptr.hbm [resolvable:$true] %s40_s30 }
   0x5   :  { %s19_s27 = sshll.u32 %s298_s26, 4  ;;  %s299_s1 = smov [#allocation6]   ;;  %s20_s27 = int_to_ptr.vmem [resolvable:$true] %s19_s27 }
   0x6   :  { %22 = dma.hbm_to_vmem [thread:$0]  %s18_s25, 128, %s20_s27, [#allocation3]  }
   0x7   :  { %s42_s6 = sshll.u32 %s299_s1, 4  ;;  %s300_s7 = smov 128   ;;  %s43_s6 = int_to_ptr.vmem [resolvable:$true] %s42_s6 }
   0x8   :  { %s301_s8 = smov 8  }
   0x9   :  { %48 = dma.hbm_to_vmem [thread:$0]  %s41_s30, 256, %s43_s6, [#allocation5], %s300_s7, %s300_s7, %s301_s8  }
   0xa   :  { %293 = dma.done.wait [#allocation3], 128  }
   0xb   :  { %294 = vsyncadd [#allocation3], 4294967168 }
   0xc   :  { %295 = dma.done.wait [#allocation5], 384  }
   0xd   :  { %296 = vsyncadd [#allocation5], 4294966912  ;;  %v302_v0 = vmov 0   ;;  %vm69_vm0 = vcmask 195584   ;;  %vm102_vm1 = vcmask 261120   ;;  %v68_v1 = vld [vmem:[#allocation4] sm:$0xff] }
   0xe   :  { %212 = vset.pattern.permute.xlu0 %v302_v0  ;;  %v65_v2 = vld [vmem:[#allocation2] sm:$0xff]  ;;  %196 = vmatpush.xpose.msk.msra.mxu0 %vm69_vm0, %v68_v1  ;;  %v66_v3 = vld [vmem:[#allocation6] sm:$0xff]  ;;  %v67_v4 = vld [vmem:[#allocation6 + $0x8] sm:$0xff]  ;;  %vm187_vm5 = vcmask 64512  }
   0xf   :  { %204 = vmatpush.xpose.msk.msra.mxu2 %vm69_vm0, %v68_v1  ;;  %199 = vmatpush.xpose.msk.msra.mxu1 %vm102_vm1, %v65_v2  ;;  %v63_v5 = vld [vmem:[%s368_s2] sm:$0xff]  ;;  %v64_v6 = vld [vmem:[%s368_s2 + $0x8] sm:$0xff] }
  0x10   :  { %205 = vmatpush.xpose.msk.msra.mxu3 %vm102_vm1, %v65_v2  ;;  %v135_v7 = vld [vmem:[%s370_s4] sm:$0xff]  ;;  %v136_v8 = vld [vmem:[%s370_s4 + $0x8] sm:$0xff] }
  0x11   :  { %139 = vperm.xlu0 %212, %v135_v7   ;;  %197 = vmatmul.msk.f32.vlgmr.msra.gmra.mxu0 %vm69_vm0, %v66_v3 }
  0x12   :  { %198 = vmatmul.msk.f32.vlgmr.msra.gmra.mxu2 %vm69_vm0, %v67_v4  ;;  %200 = vmatmul.msk.f32.vlgmr.msra.gmra.mxu1 %vm102_vm1, %v63_v5 }
  0x13   :  { %201 = vmatmul.msk.f32.vlgmr.msra.gmra.mxu3 %vm102_vm1, %v64_v6 }
  0x19   :  { %144 = vperm.xlu0 %212, %v136_v8  }
  0x83   :  { %v140_v9 = vpop.permute.xlu0 %139 }
  0x8b   :  { %v145_v18 = vpop.permute.xlu0 %144 }
  0x8e   :  { %v96_v10 = vpop.f32.mrf.mxu0 }
  0x8f   :  { %v129_v11 = vpop.f32.mrf.mxu1 }
  0x90   :  { %v130_v12 = vadd.f32 %v129_v11, %v96_v10 }
  0x92   :  { %v147_v13 = vadd.f32 %v140_v9, %v130_v12 }
  0x94   :  { %v202_v14 = vmul.f32 -1.442695, %v147_v13 }
  0x95   :  { %v99_v15 = vpop.f32.mrf.mxu2 }
  0x96   :  { %v132_v16 = vpop.f32.mrf.mxu3  ;;  %213 = vpow2.f32 %v202_v14 }
  0x97   :  { %v133_v17 = vadd.f32 %v132_v16, %v99_v15 }
  0x99   :  { %v148_v19 = vadd.f32 %v145_v18, %v133_v17 }
  0x9b   :  { %v203_v20 = vmul.f32 -1.442695, %v148_v19 }
  0x9c   :  { %v214_v21 = vpop.eup %213 }
  0x9d   :  { %215 = vpow2.f32 %v203_v20  ;;  %v155_v22 = vadd.f32 1.0, %v214_v21 }
  0x9f   :  { %217 = vrcp.f32 %v155_v22  ;;  %v168_v28 = vand.u32 2147483648, %v155_v22  ;;  %v166_v30 = vand.u32 2147483647, %v155_v22  ;;  %vm162_vm3 = vweird.f32 %v155_v22 }
  0xa1   :  { %v169_v34 = vor.u32 1.1754944e-38, %v168_v28  ;;  %vm167_vm6 = vcmp.eq.f32.partialorder %v166_v30, 8.507059e+37 }
  0xa3   :  { %v216_v23 = vpop.eup %215 }
  0xa4   :  { %v156_v24 = vadd.f32 1.0, %v216_v23 }
  0xa5   :  { %v218_v25 = vpop.eup %217 }
  0xa6   :  { %219 = vrcp.f32 %v156_v24  ;;  %v158_v26 = vmul.f32 %v218_v25, %v155_v22  ;;  %vm163_vm2 = vweird.f32 %v218_v25  ;;  %v183_v38 = vand.u32 2147483648, %v156_v24 }
  0xa7   :  { %vm164_vm4 = vmor %vm162_vm3, %vm163_vm2  ;;  %v181_v40 = vand.u32 2147483647, %v156_v24  ;;  %vm177_vm8 = vweird.f32 %v156_v24 }
  0xa8   :  { %v159_v27 = vsub.f32 1.0, %v158_v26  ;;  %v184_v42 = vor.u32 1.1754944e-38, %v183_v38 }
  0xa9   :  { %vm182_vm10 = vcmp.eq.f32.partialorder %v181_v40, 8.507059e+37 }
  0xaa   :  { %v160_v29 = vmul.f32 %v218_v25, %v159_v27 }
  0xac   :  { %v220_v31 = vpop.eup %219  ;;  %v161_v32 = vadd.f32 %v218_v25, %v160_v29 }
  0xad   :  { %v173_v33 = vmul.f32 %v220_v31, %v156_v24  ;;  %vm178_vm7 = vweird.f32 %v220_v31 }
  0xae   :  { %v165_v35 = vsel %vm164_vm4, %v218_v25, %v161_v32  ;;  %vm179_vm9 = vmor %vm177_vm8, %vm178_vm7 }
  0xaf   :  { %v174_v36 = vsub.f32 1.0, %v173_v33  ;;  %v170_v37 = vsel %vm167_vm6, %v169_v34, %v165_v35 }
  0xb0   :  { %188 = vst.msk [vmem:[%s371_s5] sm:$0xff] %vm187_vm5, %v170_v37 }
  0xb1   :  { %v175_v39 = vmul.f32 %v220_v31, %v174_v36 }
  0xb3   :  { %v176_v41 = vadd.f32 %v220_v31, %v175_v39 }
  0xb5   :  { %v180_v43 = vsel %vm179_vm9, %v220_v31, %v176_v41 }
  0xb6   :  { %v185_v44 = vsel %vm182_vm10, %v184_v42, %v180_v43 }
  0xb7   :  { %189 = vst.msk [vmem:[%s371_s5 + $0x8] sm:$0xff] %vm187_vm5, %v185_v44 }
  0xb8   :  { %194 = vsyncpa [#allocation3], 1 }
  0xb9   :  { %195 = vsyncpa [#allocation5], 1 }

</bundles_post_ra>
